<compile_context>
chip_gen: v5e
topology: v5e:2x2
jax: 0.10.0
libtpu: 0.0.40
codegen_flags: <defaults>
</compile_context>

<pallas_src>
import functools

import numpy as np
import jax
import jax.numpy as jnp
from jax.experimental import pallas as pl
from jax.experimental.pallas import tpu as pltpu

_LANE = 128
_TILE_BYTES = 4 * 1024 * 1024          # per-x-tile budget (double-buffered -> 8 MiB)
_W_RESIDENT_BYTES = 12 * 1024 * 1024   # budget for a fully VMEM-resident weight (2 bufs counted)
_VMEM_LIMIT = 32 * 1024 * 1024         # explicit scoped-VMEM limit (fits all generations)
_SMALL_BYTES = 4 * 1024 * 1024         # below this, XLA's fused reduction beats kernel overhead


def _cdiv(a, b):
    return -(-a // b)


def make_pool_weight(num_classes, map_size, no_bg, df=0.996, db=0.999):
    """Deduped (C, D) reproduction of weighted_pool.__init__.

    The original builds a (batch, C, D) array, but every batch row is
    identical (same sf/sb schedule, normalised by batch-0 rows), so a single
    (C, D) copy is numerically exact.  The original's quirks are preserved:
    with no_bg=True class 0 gets sf and classes >=1 get sf**2; class 0 is
    always normalised by its own row sum and classes >=1 by row 1's sum.
    """
    dim = map_size[0] * map_size[1]
    weight = np.ones([num_classes, dim], dtype=np.float64)
    sf = 1.0
    sb = 1.0
    for i in range(dim):
        if no_bg:
            weight[0:, i] = weight[0:, i] * sf
        else:
            weight[0, i] = weight[0, i] * sb
        weight[1:, i] = weight[1:, i] * sf
        sb = sb * db
        sf = sf * df
    weight[0, :] = weight[0, :] / np.sum(weight[0, :])
    weight[1:, :] = weight[1:, :] / np.sum(weight[1, :])
    return jnp.asarray(weight.astype(np.float32))


def _weighted_pool_kernel(x_ref, w_ref, o_ref, acc_ref, *, tile_d, d_total,
                          resident, need_mask):
    """One grid step: acc[b, c] += sum_d x[b, c, d_tile] * w[c, d_tile].

    Grid is (batch_blocks, d_blocks) with the reduction axis last, so the
    (TILE_B, C) f32 accumulator stays VMEM-resident across it and the output
    block is written exactly once, at the final reduction step.
    """
    k = pl.program_id(1)

    @pl.when(k == 0)
    def _init():
        acc_ref[...] = jnp.zeros_like(acc_ref)

    x = x_ref[...].astype(jnp.float32)                     # (TB, C, TILE_D)

    if resident:
        # Whole (zero-padded) weight is VMEM-resident (constant block index
        # -> DMA'd once for the entire grid); slice the k-th lane-aligned
        # tile in-kernel.
        start = pl.multiple_of(k * tile_d, _LANE)
        w = w_ref[:, :, pl.ds(start, tile_d)]              # (1, C, TILE_D)
    else:
        w = w_ref[...]                                     # (1, C, TILE_D)

    prod = x * w.astype(jnp.float32)                       # broadcast over batch

    if need_mask:
        # D is not a multiple of tile_d: the last d-tile of x is a partial
        # block whose tail lanes hold unspecified data -> zero them so they
        # cannot pollute the reduction (robust even to NaN garbage).
        lane = jax.lax.broadcasted_iota(jnp.int32, prod.shape, 2)
        prod = jnp.where(k * tile_d + lane < d_total, prod, 0.0)

    acc_ref[...] += jnp.sum(prod, axis=-1)                 # (TB, C)

    @pl.when(k == pl.num_programs(1) - 1)
    def _finalize():
        o_ref[...] = acc_ref[...].astype(o_ref.dtype)


def weighted_pool_forward(outputs, pool_weight, *, force_pallas=False,
                          tile_b=None, tile_groups=None, resident=None):
    """Forward pass of weighted_pool: out[b, c] = sum_d x[b, c, d] * w[c, d].

    `pool_weight` is the deduped (C, D) weight from make_pool_weight; a
    (B, C, D) module-style weight is also accepted (it is batch-identical by
    construction, so row 0 is used — this also makes the module's
    `[:dim_temp]` slice a no-op).  `tile_b` / `tile_groups` / `resident`
    override the automatic tiling (testing / tuning only).
    """
    b, c = outputs.shape[0], outputs.shape[1]
    x = outputs.reshape(b, c, -1)                          # (B, C, D)
    d = x.shape[-1]

    pw = jnp.asarray(pool_weight)
    if pw.ndim == 3:                                       # (B, C, D) module weight
        pw = pw[0]
    pw = pw.reshape(c, d)

    x_item = jnp.dtype(x.dtype).itemsize
    w_item = jnp.dtype(pw.dtype).itemsize

    def _xla_fallback():
        out = jnp.einsum('bcd,cd->bc',
                         x.astype(jnp.float32), pw.astype(jnp.float32))
        return out.astype(outputs.dtype)

    # Very large class counts would need a C-tiling path; keep it correct.
    # TODO(synk): add a C-tiling path instead of falling back for huge C.
    if c * _LANE * x_item * 8 > _TILE_BYTES:
        return _xla_fallback()

    # Small-problem fast path: launch/grid overhead dwarfs the work.
    if not force_pallas and b * c * d * x_item < _SMALL_BYTES:
        return _xla_fallback()

    # ---- batch tile (amortises per-step overhead & weight re-fetch) ----
    # Output block is (tile_b, c): tile_b must equal b or be a multiple of 8.
    if tile_b is None:
        if b <= 8:
            tile_b = b
        else:
            cap = max(8, (_TILE_BYTES // (c * _LANE * x_item)) // 8 * 8)
            # keep >= 2 batch grid steps so v7x's second TensorCore gets work
            half = max(8, (((b + 1) // 2) // 8) * 8)
            tile_b = min(cap, half)
    # TODO(synk): when b == 1 the parallel axis has a single step; splitting
    # the D reduction into two partial sums (one per v7x core) would recover
    # the second TensorCore.
    nb = _cdiv(b, tile_b)

    # ---- D (reduction) tile: lane-aligned, sized by the VMEM budget ----
    d_groups = _cdiv(d, _LANE)
    if tile_groups is None:
        budget_groups = max(1, _TILE_BYTES // (tile_b * c * _LANE * x_item))
        tile_groups = min(d_groups, budget_groups)
    tile_d = tile_groups * _LANE
    kd = _cdiv(d_groups, tile_groups)
    d_pad = kd * tile_d
    need_mask = (d_pad != d)

    # ---- weight: single deduped copy, zero-padded to the tiled extent ----
    # (padding the tiny (C, D) weight is cheap; x is NEVER padded/copied.)
    w3 = pw.reshape(1, c, d)
    if d_pad != d:
        w3 = jnp.pad(w3, ((0, 0), (0, 0), (0, d_pad - d)))
    if resident is None:
        resident = (2 * c * d_pad * w_item) <= _W_RESIDENT_BYTES
    if resident:
        w_spec = pl.BlockSpec((1, c, d_pad), lambda i, k: (0, 0, 0))
    else:
        w_spec = pl.BlockSpec((1, c, tile_d), lambda i, k: (0, 0, k))

    kernel = functools.partial(_weighted_pool_kernel, tile_d=tile_d,
                               d_total=d, resident=resident,
                               need_mask=need_mask)

    out = pl.pallas_call(
        kernel,
        out_shape=jax.ShapeDtypeStruct((b, c), outputs.dtype),
        grid_spec=pltpu.PrefetchScalarGridSpec(
            num_scalar_prefetch=0,
            grid=(nb, kd),                                 # reduction axis last
            in_specs=[
                pl.BlockSpec((tile_b, c, tile_d), lambda i, k: (i, 0, k)),
                w_spec,
            ],
            out_specs=pl.BlockSpec((tile_b, c), lambda i, k: (i, 0)),
            scratch_shapes=[pltpu.VMEM((tile_b, c), jnp.float32)],
        ),
        compiler_params=pltpu.CompilerParams(
            dimension_semantics=("parallel", "arbitrary"),
            vmem_limit_bytes=_VMEM_LIMIT,
        ),
    )(x, w3)
    return out


if __name__ == "__main__":
    def ref_forward(xx, ww):
        b_, c_ = xx.shape[0], xx.shape[1]
        return jnp.sum(
            xx.reshape(b_, c_, -1).astype(jnp.float32) *
            ww[None, :, :].astype(jnp.float32), axis=2).astype(xx.dtype)

    # Shapes consistent with the module.
    batch_size, num_classes, map_size, no_bg = 2, 4, (16, 16), False
    key = jax.random.PRNGKey(0)
    x = jax.random.normal(
        key, (batch_size, num_classes, map_size[0], map_size[1]),
        dtype=jnp.float32)
    pool_weight = make_pool_weight(num_classes, map_size, no_bg)
    ref = ref_forward(x, pool_weight)

    # 1) Default path (small-problem einsum fallback).
    out_fb = jax.block_until_ready(weighted_pool_forward(x, pool_weight))
    assert out_fb.shape == (batch_size, num_classes)
    np.testing.assert_allclose(np.asarray(out_fb), np.asarray(ref),
                               rtol=1e-5, atol=1e-5)

    # 2) Pallas path: lane-aligned D, single reduction step, resident weight.
    out_p = jax.block_until_ready(
        weighted_pool_forward(x, pool_weight, force_pallas=True))
    np.testing.assert_allclose(np.asarray(out_p), np.asarray(ref),
                               rtol=1e-5, atol=1e-5)

    # 3) Pallas path exercising batch blocking, kd>1 accumulation, non-aligned
    #    D tail masking, and the resident weight's in-kernel dynamic slice.
    b2, c2, ms2, nb2 = 16, 5, (10, 13), True               # D = 130 (not lane aligned)
    x2 = jax.random.normal(jax.random.PRNGKey(0),
                           (b2, c2, ms2[0], ms2[1]), dtype=jnp.float32)
    w2 = make_pool_weight(c2, ms2, nb2)
    ref2 = ref_forward(x2, w2)
    out2 = jax.block_until_ready(
        weighted_pool_forward(x2, w2, force_pallas=True,
                              tile_b=8, tile_groups=1))
    np.testing.assert_allclose(np.asarray(out2), np.asarray(ref2),
                               rtol=1e-5, atol=1e-5)

    # 4) Same shapes, streamed-weight path forced.
    out3 = jax.block_until_ready(
        weighted_pool_forward(x2, w2, force_pallas=True,
                              tile_b=8, tile_groups=1, resident=False))
    np.testing.assert_allclose(np.asarray(out3), np.asarray(ref2),
                               rtol=1e-5, atol=1e-5)

    print("KERNEL_OK")
</pallas_src>

<mosaic_0001>
module attributes {stable_mosaic.version = 11 : i64} {
  func.func @_weighted_pool_kernel(%arg0: i32, %arg1: i32, %arg2: memref<2x4x256xf32, #tpu.memory_space<vmem>>, %arg3: memref<1x4x256xf32, #tpu.memory_space<vmem>>, %arg4: memref<2x4xf32, #tpu.memory_space<vmem>>, %arg5: memref<2x4xf32, #tpu.memory_space<vmem>>) attributes {dimension_semantics = [#tpu.dimension_semantics<parallel>, #tpu.dimension_semantics<arbitrary>], iteration_bounds = array<i64: 1, 1>, scalar_prefetch = 0 : i64, scratch_operands = 1 : i64, tpu.core_type = #tpu.core_type<tc>, window_params = [{transform_indices = @transform_0, window_bounds = array<i64: 2, 4, 256>}, {pipeline_mode = #tpu.pipeline_mode<synchronous>, transform_indices = @transform_1, window_bounds = array<i64: 1, 4, 256>}, {transform_indices = @transform_2, window_bounds = array<i64: 2, 4>}]} {
    %c0_i32 = arith.constant 0 : i32
    %0 = arith.cmpi eq, %arg1, %c0_i32 : i32
    %1 = arith.extui %0 : i1 to i32
    %c0_i32_0 = arith.constant 0 : i32
    %2 = arith.cmpi ne, %1, %c0_i32_0 : i32
    scf.if %2 {
      %cst_11 = arith.constant 0.000000e+00 : f32
      %17 = vector.broadcast %cst_11 : f32 to vector<2x4xf32>
      %c0_12 = arith.constant 0 : index
      %c0_13 = arith.constant 0 : index
      %18 = vector.load %arg5[%c0_12, %c0_13] : memref<2x4xf32, #tpu.memory_space<vmem>>, vector<2x4xf32>
      tpu.vector_store %arg5[%c0_12, %c0_13], %17 {strides = array<i32>} : memref<2x4xf32, #tpu.memory_space<vmem>>, vector<2x4xf32>,
    } else {
    }
    %c0 = arith.constant 0 : index
    %c0_1 = arith.constant 0 : index
    %c0_2 = arith.constant 0 : index
    %3 = vector.load %arg2[%c0, %c0_1, %c0_2] : memref<2x4x256xf32, #tpu.memory_space<vmem>>, vector<2x4x256xf32>
    %c256_i32 = arith.constant 256 : i32
    %4 = arith.muli %arg1, %c256_i32 : i32
    %5 = tpu.assume_multiple %4, 128 : i32
    %c0_3 = arith.constant 0 : index
    %c0_4 = arith.constant 0 : index
    %6 = arith.index_cast %5 : i32 to index
    %7 = vector.load %arg3[%c0_3, %c0_4, %6] : memref<1x4x256xf32, #tpu.memory_space<vmem>>, vector<1x4x256xf32>
    %8 = vector.broadcast %7 : vector<1x4x256xf32> to vector<2x4x256xf32>
    %9 = arith.mulf %3, %8 : vector<2x4x256xf32>
    %c0_5 = arith.constant 0 : index
    %c0_6 = arith.constant 0 : index
    %10 = vector.load %arg5[%c0_5, %c0_6] : memref<2x4xf32, #tpu.memory_space<vmem>>, vector<2x4xf32>
    %cst = arith.constant dense<0.000000e+00> : vector<2x4xf32>
    %11 = vector.multi_reduction <add>, %9, %cst [2] : vector<2x4x256xf32> to vector<2x4xf32>
    %12 = arith.addf %10, %11 : vector<2x4xf32>
    %c0_7 = arith.constant 0 : index
    %c0_8 = arith.constant 0 : index
    %13 = vector.load %arg5[%c0_7, %c0_8] : memref<2x4xf32, #tpu.memory_space<vmem>>, vector<2x4xf32>
    tpu.vector_store %arg5[%c0_7, %c0_8], %12 {strides = array<i32>} : memref<2x4xf32, #tpu.memory_space<vmem>>, vector<2x4xf32>,
    %c0_i32_9 = arith.constant 0 : i32
    %14 = arith.cmpi eq, %arg1, %c0_i32_9 : i32
    %15 = arith.extui %14 : i1 to i32
    %c0_i32_10 = arith.constant 0 : i32
    %16 = arith.cmpi ne, %15, %c0_i32_10 : i32
    scf.if %16 {
      %c0_11 = arith.constant 0 : index
      %c0_12 = arith.constant 0 : index
      %17 = vector.load %arg5[%c0_11, %c0_12] : memref<2x4xf32, #tpu.memory_space<vmem>>, vector<2x4xf32>
      %c0_13 = arith.constant 0 : index
      %c0_14 = arith.constant 0 : index
      %18 = vector.load %arg4[%c0_13, %c0_14] : memref<2x4xf32, #tpu.memory_space<vmem>>, vector<2x4xf32>
      tpu.vector_store %arg4[%c0_13, %c0_14], %17 {strides = array<i32>} : memref<2x4xf32, #tpu.memory_space<vmem>>, vector<2x4xf32>,
    } else {
    }
    return
  }
  func.func @transform_0(%arg0: i32, %arg1: i32) -> (i32, i32, i32) {
    %c0_i32 = arith.constant 0 : i32
    %c0_i32_0 = arith.constant 0 : i32
    return %arg0, %c0_i32, %arg1 : i32, i32, i32
  }
  func.func @transform_1(%arg0: i32, %arg1: i32) -> (i32, i32, i32) {
    %c0_i32 = arith.constant 0 : i32
    %c0_i32_0 = arith.constant 0 : i32
    %c0_i32_1 = arith.constant 0 : i32
    %c0_i32_2 = arith.constant 0 : i32
    return %c0_i32, %c0_i32_0, %c0_i32_1 : i32, i32, i32
  }
  func.func @transform_2(%arg0: i32, %arg1: i32) -> (i32, i32) {
    %c0_i32 = arith.constant 0 : i32
    %c0_i32_0 = arith.constant 0 : i32
    return %arg0, %c0_i32 : i32, i32
  }
}

</mosaic_0001>

<bundles_post_ra>
// kernel: tpu_custom_call.1
= control target key start
LH: loop header
LB: loop body
LE: loop exit
PB: predicated region body
PF: predicated region fallthrough
CT: control target
= control target key end

     0   :  { %7 = vsyncpa [#allocation4], 0  ;;  %s237_s0 = inlined_call_operand.hbm [shape: f32[2,4,256], index: 0, kind: input, shape index: {}]   ;;  %s238_s1 = inlined_call_operand.hbm [shape: f32[1,4,256], index: 1, kind: input, shape index: {}]   ;;  %s239_s2 = inlined_call_operand.hbm [shape: f32[2,4], index: 2, kind: output, shape index: {}]  }
   0x1   :  { %8 = vsyncpa [#allocation7], 0 }
   0x2   :  { %9 = vsyncpa [#allocation5], 0  ;;  %s14_s11 = sshll.u32 %s237_s0, 4  ;;  %s204_s12 = smov [#allocation3]   ;;  %s15_s11 = int_to_ptr.hbm [resolvable:$true] %s14_s11 }
   0x3   :  { %s16_s13 = sshll.u32 %s204_s12, 4  ;;  %s28_s16 = sshll.u32 %s238_s1, 4  ;;  %s17_s13 = int_to_ptr.vmem [resolvable:$true] %s16_s13  ;;  %s29_s16 = int_to_ptr.hbm [resolvable:$true] %s28_s16 }
   0x4   :  { %s205_s17 = smov 128   ;;  %s206_s18 = smov 8  }
   0x5   :  { %22 = dma.hbm_to_vmem [thread:$0]  %s15_s11, 256, %s17_s13, [#allocation4], %s205_s17, %s205_s17, %s206_s18  }
   0x6   :  { %s207_s19 = smov [#allocation6]  }
   0x7   :  { %s30_s20 = sshll.u32 %s207_s19, 4  ;;  %s31_s20 = int_to_ptr.vmem [resolvable:$true] %s30_s20 }
   0x8   :  { %33 = dma.hbm_to_vmem [thread:$0]  %s29_s16, 128, %s31_s20, [#allocation7]  }
   0x9   :  { %198 = dma.done.wait [#allocation4], 256  }
   0xa   :  { %199 = vsyncadd [#allocation4], 4294967040 }
   0xb   :  { %200 = dma.done.wait [#allocation7], 128  }
   0xc   :  { %201 = vsyncadd [#allocation7], 4294967168  ;;  %v48_v0 = vld [vmem:[#allocation3] sm:$0xff]  ;;  %v55_v1 = vld [vmem:[#allocation6] sm:$0xff]  ;;  %vm72_vm0 = vcmask 1043456   ;;  %vm46_vm1 = vcmask 25600   ;;  %v85_v17 = vlaneseq }
   0xd   :  { %v49_v2 = vld [vmem:[#allocation3 + $0x8] sm:$0xff]  ;;  %v56_v3 = vmul.f32 %v55_v1, %v48_v0  ;;  %v208_v15 = vmov 0.0   ;;  %vm89_vm2 = vcmask 1041409   ;;  %s209_s0 = smov [#allocation8]   ;;  %s107_s23 = sshll.u32 %s239_s2, 4  ;;  %s108_s23 = int_to_ptr.hbm [resolvable:$true] %s107_s23 }
   0xe   :  { %v57_v4 = vmul.f32 %v55_v1, %v49_v2  ;;  %47 = vst.msk [vmem:[#allocation2] sm:$0x3] %vm46_vm1, %v208_v15  ;;  %v86_v18 = vand.u32 127, %v85_v17  ;;  %s105_s1 = sshll.u32 %s209_s0, 4  ;;  %s106_s1 = int_to_ptr.vmem [resolvable:$true] %s105_s1 }
   0xf   :  { %61 = vst [vmem:[#allocation1] ss:$2 sm:$0xff] %v56_v3 }
  0x10   :  { %65 = vst [vmem:[#allocation1 + $0x10] ss:$2 sm:$0xff] %v57_v4 }
  0x15   :  { %v58_v22 = vld [vmem:[#allocation2] sm:$0x3] }
  0x16   :  { %v62_v5 = vld.sshfl [vmem:[#allocation1] sm:$0xff pattern:$0x75316420]  ;;  %v63_v6 = vld.sshfl [vmem:[#allocation1 + $0x8] sm:$0xff pattern:$0x75316420] }
  0x17   :  { %v73_v7 = vsel %vm72_vm0, %v62_v5, 0.0  ;;  %v74_v8 = vsel %vm72_vm0, %v63_v6, 0.0  ;;  %v66_v10 = vld.sshfl [vmem:[#allocation1 + $0x10] sm:$0xff pattern:$0x75316420] }
  0x18   :  { %v75_v9 = vadd.f32 %v74_v8, %v73_v7  ;;  %v67_v11 = vld.sshfl [vmem:[#allocation1 + $0x18] sm:$0xff pattern:$0x75316420]  ;;  %v78_v12 = vsel %vm72_vm0, %v66_v10, 0.0 }
  0x19   :  { %v79_v13 = vsel %vm72_vm0, %v67_v11, 0.0 }
  0x1a   :  { %76 = vadd.xlane.f32.xlu0 %v75_v9  ;;  %v80_v14 = vadd.f32 %v79_v13, %v78_v12 }
  0x22   :  { %81 = vadd.xlane.f32.xlu0 %v80_v14 }
  0x8d   :  { %v77_v16 = vpop.xlane.xlu0 %76 }
  0x8e   :  { %v87_v20 = vperm.slane %v77_v16, %v86_v18 }
  0x95   :  { %v82_v19 = vpop.xlane.xlu0 %81 }
  0x96   :  { %v88_v21 = vperm.slane %v82_v19, %v86_v18 }
  0x98   :  { %v90_v23 = vsel %vm89_vm2, %v88_v21, %v87_v20 }
  0x99   :  { %v92_v24 = vadd.f32 %v90_v23, %v58_v22 }
  0x9b   :  { %94 = vst.msk [vmem:[#allocation2] sm:$0x3] %vm46_vm1, %v92_v24 }
  0xa2   :  { %v98_v25 = vld [vmem:[#allocation2] sm:$0x3] }
  0xa3   :  { %99 = vst.msk [vmem:[#allocation8] sm:$0x3] %vm46_vm1, %v98_v25 }
  0xa4   :  { %110 = dma.vmem_to_hbm [thread:$0]  %s106_s1, 32, %s108_s23, [#allocation5]  }
  0xa5   :  { %202 = dma.done.wait [#allocation5], 32  }
  0xa6   :  { %203 = vsyncadd [#allocation5], 4294967264 }
  0xa7   :  { %115 = vsyncpa [#allocation4], 1 }
  0xa8   :  { %116 = vsyncpa [#allocation7], 1 }
  0xa9   :  { %117 = vsyncpa [#allocation5], 1 }

</bundles_post_ra>
